<compile_context>
chip_gen: v5e
topology: v5e:2x2
jax: 0.10.0
libtpu: 0.0.40
codegen_flags: <defaults>
</compile_context>

<pallas_src>
import functools

import jax
import jax.numpy as jnp
from jax.experimental import pallas as pl
from jax.experimental.pallas import tpu as pltpu


def mlpbase_kernel(x_ref, w1_ref, w2_ref, aux_ref, out_ref):
    """Fused actor/critic MLP forward on one batch tile.

    h1  = tanh(x @ W1_fused + b1)          [tile_b, 2H]   (actor | critic)
    h2  = tanh(h1 @ W2_fused + b2)         [tile_b, 2H]   (actor | critic)
    val = sum(h2 * wcl_row, lanes) + bcl   [tile_b, 1]    (critic lanes only)
    out = h2 with lane H replaced by val   [tile_b, 2H]   (single store)
    """
    # Cast x to the weight operand dtype in-kernel (free on the VPU).
    x = x_ref[...].astype(w1_ref.dtype)

    b1 = aux_ref[0:1, :]          # layer-1 biases (actor | critic)
    b2 = aux_ref[1:2, :]          # layer-2 biases (actor | critic)
    wcl = aux_ref[2:3, :]         # value-head weights in lanes [H, 2H), zeros elsewhere
    bv = aux_ref[3:4, :]          # value bias at lane H, zeros elsewhere

    # Layer 1 (actor + critic fused on the lane axis), f32 accumulation.
    h1 = jnp.tanh(
        jnp.dot(x, w1_ref[...], preferred_element_type=jnp.float32) + b1)

    # Layer 2 (block-diagonal fused weights), f32 accumulation.
    h2 = jnp.tanh(
        jnp.dot(h1.astype(w2_ref.dtype), w2_ref[...],
                preferred_element_type=jnp.float32) + b2)

    # Value head: VPU multiply + XLU lane reduce (actor lanes of wcl are 0).
    val = jnp.sum(h2 * wcl, axis=-1, keepdims=True)          # [tile_b, 1]

    # Blend value into lane H of the output slab; add value bias via bv row.
    h2_dim = out_ref.shape[-1]
    hidden = h2_dim // 2
    lane = jax.lax.broadcasted_iota(jnp.int32, h2.shape, dimension=1)
    out = jnp.where(lane == hidden, val, h2) + bv
    out_ref[...] = out.astype(out_ref.dtype)


def _round_up(n, m):
    return ((n + m - 1) // m) * m


@functools.partial(jax.jit, static_argnames=("tile_b", "compute_dtype"))
def mlpbase_forward(x, rnn_hxs, masks, params, *, tile_b=1024,
                    compute_dtype=jnp.float32):
    """JAX wrapper mirroring MLPBase.forward (recurrent=False)."""
    del masks  # unused when recurrent=False
    B, num_inputs = x.shape
    H2 = params["w1"].shape[1]        # 2 * hidden_size
    H = H2 // 2

    # Tile the batch.  Cap the tile at ~ceil(B/2) rounded up to 8 so the grid
    # has >= 2 steps when B allows (keeps both v7x TensorCores busy); Pallas
    # handles the ragged last block (OOB output rows are discarded).
    half_b = _round_up(pl.cdiv(B, 2), 8)
    tile_b_eff = max(8, min(tile_b, half_b))
    grid = (pl.cdiv(B, tile_b_eff),)

    # Operand dtype is a bandwidth knob only; weights are tiny so the cast is
    # negligible, x is cast inside the kernel, accumulation stays f32.
    w1 = params["w1"].astype(compute_dtype)
    w2 = params["w2"].astype(compute_dtype)
    aux = params["aux"]               # stays f32 (biases + value-head row)

    out = pl.pallas_call(
        mlpbase_kernel,
        out_shape=jax.ShapeDtypeStruct((B, H2), jnp.float32),
        grid_spec=pltpu.PrefetchScalarGridSpec(
            num_scalar_prefetch=0,
            grid=grid,
            in_specs=[
                pl.BlockSpec((tile_b_eff, num_inputs), lambda i: (i, 0)),
                pl.BlockSpec(w1.shape, lambda i: (0, 0)),    # VMEM-resident
                pl.BlockSpec(w2.shape, lambda i: (0, 0)),
                pl.BlockSpec(aux.shape, lambda i: (0, 0)),
            ],
            out_specs=pl.BlockSpec((tile_b_eff, H2), lambda i: (i, 0)),
        ),
        compiler_params=pltpu.CompilerParams(
            dimension_semantics=("parallel",)),
    )(x, w1, w2, aux)

    actor = out[:, :H]
    value = out[:, H:H + 1]
    # recurrent=False: rnn_hxs returned unchanged.
    return value, actor, rnn_hxs


def orthogonal_init(key, shape, gain):
    """Deterministic equivalent of nn.init.orthogonal_ (gain-scaled QR)."""
    n_rows, n_cols = shape
    flat = jax.random.normal(key, (max(n_rows, n_cols), min(n_rows, n_cols)),
                             dtype=jnp.float32)
    q, r = jnp.linalg.qr(flat)
    q = q * jnp.sign(jnp.diag(r))
    if n_rows < n_cols:
        q = q.T
    return gain * q[:n_rows, :n_cols]


def make_params(key, num_inputs, hidden_size):
    """Build raw (per-branch) params + fused operands for the kernel."""
    gain = jnp.sqrt(2.0)
    keys = jax.random.split(key, 5)
    # PyTorch Linear weight is [out, in]; we store the transpose [in, out].
    wa1 = orthogonal_init(keys[0], (hidden_size, num_inputs), gain).T
    wa2 = orthogonal_init(keys[1], (hidden_size, hidden_size), gain).T
    wc1 = orthogonal_init(keys[2], (hidden_size, num_inputs), gain).T
    wc2 = orthogonal_init(keys[3], (hidden_size, hidden_size), gain).T
    wcl = orthogonal_init(keys[4], (1, hidden_size), gain).T            # [H, 1]

    # Biases: nn.init.constant_(b, 0) in the original module.
    ba1 = jnp.zeros((hidden_size,), jnp.float32)
    ba2 = jnp.zeros((hidden_size,), jnp.float32)
    bc1 = jnp.zeros((hidden_size,), jnp.float32)
    bc2 = jnp.zeros((hidden_size,), jnp.float32)
    bcl = jnp.zeros((1,), jnp.float32)

    H = hidden_size
    # Fused layer 1: actor in lanes [0, H), critic in lanes [H, 2H).
    w1 = jnp.concatenate([wa1, wc1], axis=1)                     # [in, 2H]
    # Fused layer 2: block-diagonal.
    w2 = jnp.zeros((2 * H, 2 * H), jnp.float32)
    w2 = w2.at[:H, :H].set(wa2).at[H:, H:].set(wc2)              # [2H, 2H]
    # Aux operand: row0 = b1, row1 = b2, row2 = value-head weights (critic
    # lanes), row3 = value bias at lane H.
    aux = jnp.zeros((4, 2 * H), jnp.float32)
    aux = aux.at[0, :H].set(ba1).at[0, H:].set(bc1)
    aux = aux.at[1, :H].set(ba2).at[1, H:].set(bc2)
    aux = aux.at[2, H:].set(wcl[:, 0])
    aux = aux.at[3, H].set(bcl[0])

    return {
        # fused operands consumed by the kernel
        "w1": w1, "w2": w2, "aux": aux,
        # raw per-branch params for the pure-JAX reference
        "wa1": wa1, "ba1": ba1, "wa2": wa2, "ba2": ba2,
        "wc1": wc1, "bc1": bc1, "wc2": wc2, "bc2": bc2,
        "wcl": wcl, "bcl": bcl,
    }


def reference_forward(x, params):
    """Pure-JAX reference matching MLPBase.forward (recurrent=False)."""
    a1 = jnp.tanh(x @ params["wa1"] + params["ba1"])
    actor = jnp.tanh(a1 @ params["wa2"] + params["ba2"])
    c1 = jnp.tanh(x @ params["wc1"] + params["bc1"])
    critic = jnp.tanh(c1 @ params["wc2"] + params["bc2"])
    value = critic @ params["wcl"] + params["bcl"]
    return value, actor


if __name__ == "__main__":
    B, NUM_INPUTS, HIDDEN = 8, 32, 64

    key = jax.random.PRNGKey(0)
    k_x, k_p, k_x2 = jax.random.split(key, 3)

    x = jax.random.normal(k_x, (B, NUM_INPUTS), dtype=jnp.float32)
    rnn_hxs = jnp.zeros((B, 1), dtype=jnp.float32)   # recurrent_hidden_state_size == 1
    masks = jnp.ones((B, 1), dtype=jnp.float32)
    params = make_params(k_p, NUM_INPUTS, HIDDEN)

    ref_value, ref_actor = reference_forward(x, params)

    # f32 operand path (default; tight tolerance).
    value, actor, hxs_out = mlpbase_forward(x, rnn_hxs, masks, params)
    jax.block_until_ready((value, actor, hxs_out))

    assert value.shape == (B, 1)
    assert actor.shape == (B, HIDDEN)
    assert hxs_out.shape == rnn_hxs.shape
    assert jnp.allclose(value, ref_value, atol=1e-5, rtol=1e-5)
    assert jnp.allclose(actor, ref_actor, atol=1e-5, rtol=1e-5)

    # Ragged batch (B not a multiple of the tile) to exercise the cdiv grid /
    # masked last block path.
    B2 = 20
    x2 = jax.random.normal(k_x2, (B2, NUM_INPUTS), dtype=jnp.float32)
    rnn_hxs2 = jnp.zeros((B2, 1), dtype=jnp.float32)
    masks2 = jnp.ones((B2, 1), dtype=jnp.float32)
    ref_value2, ref_actor2 = reference_forward(x2, params)
    value2, actor2, _ = mlpbase_forward(x2, rnn_hxs2, masks2, params)
    jax.block_until_ready((value2, actor2))
    assert value2.shape == (B2, 1) and actor2.shape == (B2, HIDDEN)
    assert jnp.allclose(value2, ref_value2, atol=1e-5, rtol=1e-5)
    assert jnp.allclose(actor2, ref_actor2, atol=1e-5, rtol=1e-5)

    # bf16 operand path (bandwidth knob; f32 accumulation), loose check.
    value_bf16, actor_bf16, _ = mlpbase_forward(
        x, rnn_hxs, masks, params, compute_dtype=jnp.bfloat16)
    jax.block_until_ready((value_bf16, actor_bf16))
    assert jnp.allclose(value_bf16, ref_value, atol=1e-1, rtol=1e-1)
    assert jnp.allclose(actor_bf16, ref_actor, atol=1e-1, rtol=1e-1)

    print("KERNEL_OK")
</pallas_src>

<mosaic_0001>
module attributes {stable_mosaic.version = 11 : i64} {
  func.func @mlpbase_kernel(%arg0: i32, %arg1: memref<8x32xf32, #tpu.memory_space<vmem>>, %arg2: memref<32x128xf32, #tpu.memory_space<vmem>>, %arg3: memref<128x128xf32, #tpu.memory_space<vmem>>, %arg4: memref<4x128xf32, #tpu.memory_space<vmem>>, %arg5: memref<8x128xf32, #tpu.memory_space<vmem>>) attributes {dimension_semantics = [#tpu.dimension_semantics<parallel>], iteration_bounds = array<i64: 1>, scalar_prefetch = 0 : i64, scratch_operands = 0 : i64, tpu.core_type = #tpu.core_type<tc>, window_params = [{transform_indices = @transform_0, window_bounds = array<i64: 8, 32>}, {pipeline_mode = #tpu.pipeline_mode<synchronous>, transform_indices = @transform_1, window_bounds = array<i64: 32, 128>}, {pipeline_mode = #tpu.pipeline_mode<synchronous>, transform_indices = @transform_2, window_bounds = array<i64: 128, 128>}, {pipeline_mode = #tpu.pipeline_mode<synchronous>, transform_indices = @transform_3, window_bounds = array<i64: 4, 128>}, {transform_indices = @transform_4, window_bounds = array<i64: 8, 128>}]} {
    %c0 = arith.constant 0 : index
    %c0_0 = arith.constant 0 : index
    %0 = vector.load %arg1[%c0, %c0_0] : memref<8x32xf32, #tpu.memory_space<vmem>>, vector<8x32xf32>
    %c0_1 = arith.constant 0 : index
    %c0_2 = arith.constant 0 : index
    %1 = vector.load %arg4[%c0_1, %c0_2] : memref<4x128xf32, #tpu.memory_space<vmem>>, vector<1x128xf32>
    %c1 = arith.constant 1 : index
    %c0_3 = arith.constant 0 : index
    %2 = vector.load %arg4[%c1, %c0_3] : memref<4x128xf32, #tpu.memory_space<vmem>>, vector<1x128xf32>
    %c2 = arith.constant 2 : index
    %c0_4 = arith.constant 0 : index
    %3 = vector.load %arg4[%c2, %c0_4] : memref<4x128xf32, #tpu.memory_space<vmem>>, vector<1x128xf32>
    %c3 = arith.constant 3 : index
    %c0_5 = arith.constant 0 : index
    %4 = vector.load %arg4[%c3, %c0_5] : memref<4x128xf32, #tpu.memory_space<vmem>>, vector<1x128xf32>
    %c0_6 = arith.constant 0 : index
    %c0_7 = arith.constant 0 : index
    %5 = vector.load %arg2[%c0_6, %c0_7] : memref<32x128xf32, #tpu.memory_space<vmem>>, vector<32x128xf32>
    %cst = arith.constant dense<0.000000e+00> : vector<8x128xf32>
    %6 = tpu.matmul %0, %5, %cst {dimension_numbers = #tpu.dot_dimension_numbers<[1], [0], [0], [1], [0, 0, 1, 1], [], []>} : vector<8x32xf32>, vector<32x128xf32>, vector<8x128xf32> -> vector<8x128xf32>
    %7 = vector.broadcast %1 : vector<1x128xf32> to vector<8x128xf32>
    %8 = arith.addf %6, %7 : vector<8x128xf32>
    %9 = math.tanh %8 : vector<8x128xf32>
    %c0_8 = arith.constant 0 : index
    %c0_9 = arith.constant 0 : index
    %10 = vector.load %arg3[%c0_8, %c0_9] : memref<128x128xf32, #tpu.memory_space<vmem>>, vector<128x128xf32>
    %cst_10 = arith.constant dense<0.000000e+00> : vector<8x128xf32>
    %11 = tpu.matmul %9, %10, %cst_10 {dimension_numbers = #tpu.dot_dimension_numbers<[1], [0], [0], [1], [0, 0, 1, 1], [], []>} : vector<8x128xf32>, vector<128x128xf32>, vector<8x128xf32> -> vector<8x128xf32>
    %12 = vector.broadcast %2 : vector<1x128xf32> to vector<8x128xf32>
    %13 = arith.addf %11, %12 : vector<8x128xf32>
    %14 = math.tanh %13 : vector<8x128xf32>
    %15 = vector.broadcast %3 : vector<1x128xf32> to vector<8x128xf32>
    %16 = arith.mulf %14, %15 : vector<8x128xf32>
    %cst_11 = arith.constant dense<0.000000e+00> : vector<8xf32>
    %17 = vector.multi_reduction <add>, %16, %cst_11 [1] : vector<8x128xf32> to vector<8xf32>
    %18 = vector.shape_cast %17 : vector<8xf32> to vector<8x1xf32>
    %19 = tpu.iota {dimensions = array<i32: 1>} : vector<8x128xi32>
    %c64_i32 = arith.constant 64 : i32
    %20 = vector.broadcast %c64_i32 : i32 to vector<8x128xi32>
    %21 = arith.cmpi eq, %19, %20 : vector<8x128xi32>
    %22 = vector.shape_cast %18 : vector<8x1xf32> to vector<8x1xf32>
    %23 = vector.broadcast %22 : vector<8x1xf32> to vector<8x128xf32>
    %24 = arith.select %21, %23, %14 : vector<8x128xi1>, vector<8x128xf32>
    %25 = vector.broadcast %4 : vector<1x128xf32> to vector<8x128xf32>
    %26 = arith.addf %24, %25 : vector<8x128xf32>
    %c0_12 = arith.constant 0 : index
    %c0_13 = arith.constant 0 : index
    %27 = vector.load %arg5[%c0_12, %c0_13] : memref<8x128xf32, #tpu.memory_space<vmem>>, vector<8x128xf32>
    tpu.vector_store %arg5[%c0_12, %c0_13], %26 {strides = array<i32>} : memref<8x128xf32, #tpu.memory_space<vmem>>, vector<8x128xf32>,
    return
  }
  func.func @transform_0(%arg0: i32) -> (i32, i32) {
    %c0_i32 = arith.constant 0 : i32
    %c0_i32_0 = arith.constant 0 : i32
    return %arg0, %c0_i32 : i32, i32
  }
  func.func @transform_1(%arg0: i32) -> (i32, i32) {
    %c0_i32 = arith.constant 0 : i32
    %c0_i32_0 = arith.constant 0 : i32
    %c0_i32_1 = arith.constant 0 : i32
    return %c0_i32, %c0_i32_0 : i32, i32
  }
  func.func @transform_2(%arg0: i32) -> (i32, i32) {
    %c0_i32 = arith.constant 0 : i32
    %c0_i32_0 = arith.constant 0 : i32
    %c0_i32_1 = arith.constant 0 : i32
    return %c0_i32, %c0_i32_0 : i32, i32
  }
  func.func @transform_3(%arg0: i32) -> (i32, i32) {
    %c0_i32 = arith.constant 0 : i32
    %c0_i32_0 = arith.constant 0 : i32
    %c0_i32_1 = arith.constant 0 : i32
    return %c0_i32, %c0_i32_0 : i32, i32
  }
  func.func @transform_4(%arg0: i32) -> (i32, i32) {
    %c0_i32 = arith.constant 0 : i32
    %c0_i32_0 = arith.constant 0 : i32
    return %arg0, %c0_i32 : i32, i32
  }
}

</mosaic_0001>

<bundles_post_ra>
// kernel: mlpbase_forward.1
= control target key start
LH: loop header
LB: loop body
LE: loop exit
PB: predicated region body
PF: predicated region fallthrough
CT: control target
= control target key end

     0   :  { %9 = vsyncpa [#allocation3], 0  ;;  %s330_s0 = inlined_call_operand.hbm [shape: f32[8,32], index: 0, kind: input, shape index: {}]   ;;  %s331_s1 = inlined_call_operand.hbm [shape: f32[32,128], index: 1, kind: input, shape index: {}]   ;;  %s332_s2 = inlined_call_operand.hbm [shape: f32[128,128], index: 2, kind: input, shape index: {}]   ;;  %s333_s3 = inlined_call_operand.hbm [shape: f32[4,128], index: 3, kind: input, shape index: {}]   ;;  %s334_s4 = inlined_call_operand.vmem [shape: f32[8,128], index: 4, kind: output, shape index: {}]  }
   0x1   :  { %10 = vsyncpa [#allocation5], 0  ;;  %s27_s17 = sshll.u32 %s331_s1, 4  ;;  %s28_s17 = int_to_ptr.hbm [resolvable:$true] %s27_s17 }
   0x2   :  { %11 = vsyncpa [#allocation8], 0  ;;  %s284_s18 = smov [#allocation4]   ;;  %s17_s22 = sshll.u32 %s330_s0, 4  ;;  %s18_s22 = int_to_ptr.hbm [resolvable:$true] %s17_s22 }
   0x3   :  { %s29_s19 = sshll.u32 %s284_s18, 4  ;;  %s285_s23 = smov 128   ;;  %s30_s19 = int_to_ptr.vmem [resolvable:$true] %s29_s19 }
   0x4   :  { %s286_s24 = smov 8   ;;  %s287_s25 = smov [#allocation2]  }
   0x5   :  { %35 = dma.hbm_to_vmem [thread:$0]  %s28_s17, 512, %s30_s19, [#allocation5], %s285_s23, %s285_s23, %s286_s24  }
   0x6   :  { %s19_s26 = sshll.u32 %s287_s25, 4  ;;  %s40_s29 = sshll.u32 %s332_s2, 4  ;;  %s20_s26 = int_to_ptr.vmem [resolvable:$true] %s19_s26  ;;  %s41_s29 = int_to_ptr.hbm [resolvable:$true] %s40_s29 }
   0x7   :  { %22 = dma.hbm_to_vmem [thread:$0]  %s18_s22, 128, %s20_s26, [#allocation3]  }
   0x8   :  { %s54_s5 = sshll.u32 %s333_s3, 4  ;;  %s288_s6 = smov [#allocation6]   ;;  %s55_s5 = int_to_ptr.hbm [resolvable:$true] %s54_s5 }
   0x9   :  { %s42_s7 = sshll.u32 %s288_s6, 4  ;;  %s289_s0 = smov [#allocation7]   ;;  %s43_s7 = int_to_ptr.vmem [resolvable:$true] %s42_s7 }
   0xa   :  { %48 = dma.hbm_to_vmem [thread:$0]  %s41_s29, 2048, %s43_s7, [#allocation5], %s285_s23, %s285_s23, %s286_s24  }
   0xb   :  { %s56_s8 = sshll.u32 %s289_s0, 4  ;;  %s57_s8 = int_to_ptr.vmem [resolvable:$true] %s56_s8 }
   0xc   :  { %59 = dma.hbm_to_vmem [thread:$0]  %s55_s5, 64, %s57_s8, [#allocation8]  }
   0xd   :  { %278 = dma.done.wait [#allocation3], 128  }
   0xe   :  { %279 = vsyncadd [#allocation3], 4294967168 }
   0xf   :  { %280 = dma.done.wait [#allocation5], 2560  }
  0x10   :  { %281 = vsyncadd [#allocation5], 4294964736 }
  0x11   :  { %282 = dma.done.wait [#allocation8], 64  }
  0x12   :  { %283 = vsyncadd [#allocation8], 4294967232  ;;  %v84_v0 = vld [vmem:[#allocation4 + $0x18] sm:$0xff]  ;;  %v83_v1 = vld [vmem:[#allocation4 + $0x10] sm:$0xff]  ;;  %vm86_vm0 = vcmask 261120   ;;  %v153_v31 = vlaneseq }
  0x13   :  { %102 = vmatpush.msra.mxu0 %v84_v0  ;;  %v126_v2 = vld [vmem:[#allocation6 + $0x78] sm:$0xff]  ;;  %v82_v3 = vld [vmem:[#allocation4 + $0x8] sm:$0xff]  ;;  %v125_v4 = vld [vmem:[#allocation6 + $0x70] sm:$0xff] }
  0x14   :  { %128 = vmatpush.msra.mxu1 %v126_v2  ;;  %v124_v5 = vld [vmem:[#allocation6 + $0x68] sm:$0xff]  ;;  %v81_v6 = vld [vmem:[#allocation4] sm:$0xff]  ;;  %v76_v7 = vld [vmem:[#allocation2] sm:$0xff]  ;;  %v154_v32 = vand.u32 127, %v153_v31 }
  0x15   :  { %103 = vmatpush.msra.mxu0 %v83_v1  ;;  %v123_v8 = vld [vmem:[#allocation6 + $0x60] sm:$0xff]  ;;  %v122_v9 = vld [vmem:[#allocation6 + $0x58] sm:$0xff]  ;;  %v121_v10 = vld [vmem:[#allocation6 + $0x50] sm:$0xff] }
  0x16   :  { %129 = vmatpush.msra.mxu1 %v125_v4  ;;  %v120_v11 = vld [vmem:[#allocation6 + $0x48] sm:$0xff]  ;;  %v119_v12 = vld [vmem:[#allocation6 + $0x40] sm:$0xff]  ;;  %v118_v13 = vld [vmem:[#allocation6 + $0x38] sm:$0xff]  ;;  %vm155_vm1 = vcmp.eq.s32.totalorder %v154_v32, 64 }
  0x17   :  { %104 = vmatpush.msra.mxu0 %v82_v3  ;;  %v117_v14 = vld [vmem:[#allocation6 + $0x30] sm:$0xff]  ;;  %v116_v15 = vld [vmem:[#allocation6 + $0x28] sm:$0xff]  ;;  %v115_v16 = vld [vmem:[#allocation6 + $0x20] sm:$0xff] }
  0x18   :  { %130 = vmatpush.msra.mxu1 %v124_v5  ;;  %v114_v17 = vld [vmem:[#allocation6 + $0x18] sm:$0xff]  ;;  %v113_v18 = vld [vmem:[#allocation6 + $0x10] sm:$0xff]  ;;  %v112_v19 = vld [vmem:[#allocation6 + $0x8] sm:$0xff] }
  0x19   :  { %105 = vmatpush.msra.mxu0 %v81_v6  ;;  %v111_v20 = vld [vmem:[#allocation6] sm:$0xff] }
  0x1a   :  { %167 = vmatmul.msk.f32.vlgmr.msra.gmra.mxu0 %vm86_vm0, %v76_v7  ;;  %131 = vmatpush.msra.mxu1 %v123_v8  ;;  %v174_v21 = vld [vmem:[#allocation7] ss:$0 sm:$0xff]  ;;  %v175_v25 = vld [vmem:[#allocation7 + $0x1] ss:$0 sm:$0xff]  ;;  %v176_v28 = vld [vmem:[#allocation7 + $0x2] ss:$0 sm:$0xff] }
  0x1b   :  { %v177_v33 = vld [vmem:[#allocation7 + $0x3] ss:$0 sm:$0xff] }
  0x1c   :  { %132 = vmatpush.msra.mxu1 %v122_v9 }
  0x1e   :  { %133 = vmatpush.msra.mxu1 %v121_v10 }
  0x20   :  { %134 = vmatpush.msra.mxu1 %v120_v11 }
  0x22   :  { %135 = vmatpush.msra.mxu1 %v119_v12 }
  0x24   :  { %136 = vmatpush.msra.mxu1 %v118_v13 }
  0x26   :  { %137 = vmatpush.msra.mxu1 %v117_v14 }
  0x28   :  { %138 = vmatpush.msra.mxu1 %v116_v15 }
  0x2a   :  { %139 = vmatpush.msra.mxu1 %v115_v16 }
  0x2c   :  { %140 = vmatpush.msra.mxu1 %v114_v17 }
  0x2e   :  { %141 = vmatpush.msra.mxu1 %v113_v18 }
  0x30   :  { %142 = vmatpush.msra.mxu1 %v112_v19 }
  0x32   :  { %143 = vmatpush.msra.mxu1 %v111_v20 }
  0x97   :  { %v107_v22 = vpop.f32.mrf.mxu0 }
  0x98   :  { %v108_v23 = vadd.f32 %v174_v21, %v107_v22 }
  0x9a   :  { %178 = vtanh.f32 %v108_v23 }
  0xa0   :  { %v179_v24 = vpop.eup %178 }
  0xa1   :  { %144 = vmatmul.f32.vlgmr.msra.gmra.mxu1 %v179_v24 }
 0x11e   :  { %v145_v26 = vpop.f32.mrf.mxu1 }
 0x11f   :  { %v146_v27 = vadd.f32 %v175_v25, %v145_v26 }
 0x121   :  { %180 = vtanh.f32 %v146_v27 }
 0x127   :  { %v181_v29 = vpop.eup %180 }
 0x128   :  { %v150_v30 = vmul.f32 %v181_v29, %v176_v28 }
 0x12a   :  { %151 = vadd.xlane.f32.xlu0 %v150_v30 }
 0x19d   :  { %v152_v34 = vpop.xlane.xlu0 %151 }
 0x19e   :  { %v156_v35 = vsel %vm155_vm1, %v152_v34, %v181_v29 }
 0x19f   :  { %v158_v36 = vadd.f32 %v177_v33, %v156_v35 }
 0x1a1   :  { %159 = vst [vmem:[%s334_s4] sm:$0xff] %v158_v36 }
 0x1a2   :  { %164 = vsyncpa [#allocation3], 1 }
 0x1a3   :  { %165 = vsyncpa [#allocation5], 1 }
 0x1a4   :  { %166 = vsyncpa [#allocation8], 1 }

</bundles_post_ra>
